<compile_context>
chip_gen: v6e
topology: v6e:2x2x1
jax: 0.10.0
libtpu: 0.0.40
codegen_flags: <defaults>
</compile_context>

<pallas_src>
import jax
import jax.numpy as jnp
from jax.experimental import pallas as pl
from jax.experimental.pallas import tpu as pltpu


def _round_up(x, m):
    return ((x + m - 1) // m) * m


def _vmem_capacity_bytes():
    """Physical VMEM of the local TPU generation; conservative fallback."""
    try:
        return int(pltpu.get_tpu_info().vmem_capacity_bytes)
    except Exception:
        return 64 << 20  # v7x-sized fallback: safe on every generation


def _patch_embed_kernel(x_ref, w_ref, b_ref, o_ref):
    # x_ref: (tm, K), w_ref: (K, te), b_ref: (1, te) f32, o_ref: (tm, te)
    acc = jnp.dot(x_ref[...], w_ref[...], preferred_element_type=jnp.float32)
    o_ref[...] = (acc + b_ref[...]).astype(o_ref.dtype)


def patch_embed_simple(x, weight, bias, patch_size, *,
                       block_m=2048, compute_dtype=None, fuse_patchify=False):
    """x: (B, C, H, W)  weight: (E, C, P, P)  bias: (E,)  ->  (B, N, E)."""
    B, C, H, W = x.shape
    P = patch_size
    assert H % P == 0 and W % P == 0
    E = weight.shape[0]
    nh, nw = H // P, W // P
    N = nh * nw
    K = C * P * P
    M = B * N

    out_dtype = jnp.dtype(x.dtype)
    if compute_dtype is None:
        cdtype = jnp.dtype(jnp.bfloat16) if out_dtype == jnp.float32 else out_dtype
    else:
        cdtype = jnp.dtype(compute_dtype)
    in_bytes = cdtype.itemsize
    out_bytes = out_dtype.itemsize

    # --- glue: patchify (B,C,H,W) -> (M, K) in (c, ph_i, pw_j) order (matches Conv2d) ---
    # Cast first so the transpose moves the narrow dtype.
    xp = x.astype(cdtype).reshape(B, C, nh, P, nw, P)
    xp = jnp.transpose(xp, (0, 2, 4, 1, 3, 5))            # (B, nh, nw, C, P, P)
    x2d = xp.reshape(M, K)

    # conv weight (E, C, P, P) -> matmul weight (K, E); bias kept in f32 for the add.
    w2d = weight.reshape(E, K).T.astype(cdtype)
    b2d = bias.astype(jnp.float32).reshape(1, E)

    # --- generation-aware VMEM budget & tiling -------------------------------------
    budget = int(_vmem_capacity_bytes() * 0.8)             # ~51 MiB v7x, ~102 MiB v5e/v6e
    w_bytes = K * E * in_bytes
    resident = (E < 256) or (2 * (w_bytes + E * 4) <= budget // 2)
    te = E if resident else (512 if E >= 512 else 256)      # multiples of 256 for 2x256 MXU

    # row tile: multiple of 8 (or == M when M < 8), >= 2 tiles when there is enough work
    if M <= 8:
        tm = M
    else:
        tm = max(8, (min(block_m, M) // 8) * 8)
        if M >= 512:
            tm = min(tm, _round_up(-(-M // 2), 8))          # at least 2 row tiles (2 TCs)

    # cap tm so the double-buffered working set fits the per-generation budget
    fixed = 2 * (K * te * in_bytes + te * 4)                # weight + bias buffers (x2)
    per_row = 2 * (K * in_bytes + te * out_bytes)           # x tile + out tile (x2)
    tm_cap = max(8, ((budget - fixed) // per_row // 8) * 8)
    tm = min(tm, tm_cap) if M > 8 else tm

    need = fixed + tm * per_row
    vmem_limit = int(min(budget, max(32 << 20, need + (8 << 20))))
    vmem_limit = max(vmem_limit, need)                       # never clamp below real need

    m_tiles = pl.cdiv(M, tm)
    if resident:
        grid = (m_tiles,)
        in_specs = [
            pl.BlockSpec((tm, K), lambda i: (i, 0)),
            pl.BlockSpec((K, E), lambda i: (0, 0)),          # fetched once, stays in VMEM
            pl.BlockSpec((1, E), lambda i: (0, 0)),
        ]
        out_specs = pl.BlockSpec((tm, E), lambda i: (i, 0))
        dims = ("parallel",)
        x_reads = 1
    else:
        e_tiles = pl.cdiv(E, te)
        grid = (e_tiles, m_tiles)                            # E outer: weight tile fetched once/sweep
        in_specs = [
            pl.BlockSpec((tm, K), lambda j, i: (i, 0)),
            pl.BlockSpec((K, te), lambda j, i: (0, j)),
            pl.BlockSpec((1, te), lambda j, i: (0, j)),
        ]
        out_specs = pl.BlockSpec((tm, te), lambda j, i: (i, j))
        dims = ("parallel", "parallel")
        x_reads = e_tiles

    cost = pl.CostEstimate(
        flops=2 * M * K * E,
        transcendentals=0,
        bytes_accessed=x_reads * x2d.nbytes + w2d.nbytes + b2d.nbytes + M * E * out_bytes,
    )
    compiler_params = pltpu.CompilerParams(
        dimension_semantics=dims,
        vmem_limit_bytes=vmem_limit,
        allow_input_fusion=([True, False, False] if fuse_patchify else None),
    )

    out2d = pl.pallas_call(
        _patch_embed_kernel,
        out_shape=jax.ShapeDtypeStruct((M, E), out_dtype),
        grid_spec=pltpu.PrefetchScalarGridSpec(
            num_scalar_prefetch=0,
            grid=grid,
            in_specs=in_specs,
            out_specs=out_specs,
        ),
        compiler_params=compiler_params,
        cost_estimate=cost,
    )(x2d, w2d, b2d)

    return out2d.reshape(B, N, E)


def _reference(x, weight, bias, patch_size):
    # pure-JAX reference: strided conv == patchify + matmul
    B, C, H, W = x.shape
    P = patch_size
    E = weight.shape[0]
    nh, nw = H // P, W // P
    xp = x.reshape(B, C, nh, P, nw, P)
    xp = jnp.transpose(xp, (0, 2, 4, 1, 3, 5)).reshape(B, nh * nw, C * P * P)
    return jnp.einsum("bnk,ek->bne", xp, weight.reshape(E, -1)) + bias


if __name__ == "__main__":
    key = jax.random.PRNGKey(0)
    k_x, k_w, k_b = jax.random.split(key, 3)

    # small shapes consistent with the module
    B, C, H, W = 2, 4, 16, 16
    patch_size = 4
    embed_dim = 32

    x = jax.random.normal(k_x, (B, C, H, W), dtype=jnp.float32)
    weight = jax.random.normal(
        k_w, (embed_dim, C, patch_size, patch_size), dtype=jnp.float32) * 0.02
    bias = jax.random.normal(k_b, (embed_dim,), dtype=jnp.float32) * 0.02

    N = (H // patch_size) * (W // patch_size)
    ref = _reference(x, weight, bias, patch_size)

    # default path: bf16 compute on the MXU with f32 accumulation
    out = jax.block_until_ready(patch_embed_simple(x, weight, bias, patch_size))
    assert out.shape == (B, N, embed_dim)
    assert jnp.allclose(out, ref, atol=3e-2, rtol=3e-2)

    # full f32 compute path, tight tolerance
    out_f32 = jax.block_until_ready(
        patch_embed_simple(x, weight, bias, patch_size, compute_dtype=jnp.float32))
    assert out_f32.shape == (B, N, embed_dim)
    assert jnp.allclose(out_f32, ref, atol=1e-4, rtol=1e-4)

    # ragged-M path (M = 50 not a multiple of the row tile): no pad / slice copies
    H2 = W2 = 20
    x2 = jax.random.normal(k_x, (B, C, H2, W2), dtype=jnp.float32)
    ref2 = _reference(x2, weight, bias, patch_size)
    out2 = jax.block_until_ready(
        patch_embed_simple(x2, weight, bias, patch_size,
                           block_m=16, compute_dtype=jnp.float32))
    assert out2.shape == ref2.shape
    assert jnp.allclose(out2, ref2, atol=1e-4, rtol=1e-4)

    print("KERNEL_OK")
</pallas_src>

<mosaic_0001>
module attributes {stable_mosaic.version = 11 : i64} {
  func.func @_patch_embed_kernel(%arg0: i32, %arg1: memref<32x64xbf16, #tpu.memory_space<vmem>>, %arg2: memref<64x32xbf16, #tpu.memory_space<vmem>>, %arg3: memref<1x32xf32, #tpu.memory_space<vmem>>, %arg4: memref<32x32xf32, #tpu.memory_space<vmem>>) attributes {dimension_semantics = [#tpu.dimension_semantics<parallel>], iteration_bounds = array<i64: 1>, scalar_prefetch = 0 : i64, scratch_operands = 0 : i64, tpu.core_type = #tpu.core_type<tc>, window_params = [{transform_indices = @transform_0, window_bounds = array<i64: 32, 64>}, {pipeline_mode = #tpu.pipeline_mode<synchronous>, transform_indices = @transform_1, window_bounds = array<i64: 64, 32>}, {pipeline_mode = #tpu.pipeline_mode<synchronous>, transform_indices = @transform_2, window_bounds = array<i64: 1, 32>}, {transform_indices = @transform_3, window_bounds = array<i64: 32, 32>}]} {
    %c0 = arith.constant 0 : index
    %c0_0 = arith.constant 0 : index
    %0 = vector.load %arg1[%c0, %c0_0] : memref<32x64xbf16, #tpu.memory_space<vmem>>, vector<32x64xbf16>
    %c0_1 = arith.constant 0 : index
    %c0_2 = arith.constant 0 : index
    %1 = vector.load %arg2[%c0_1, %c0_2] : memref<64x32xbf16, #tpu.memory_space<vmem>>, vector<64x32xbf16>
    %cst = arith.constant dense<0.000000e+00> : vector<32x32xf32>
    %2 = tpu.matmul %0, %1, %cst {dimension_numbers = #tpu.dot_dimension_numbers<[1], [0], [0], [1], [0, 0, 1, 1], [], []>} : vector<32x64xbf16>, vector<64x32xbf16>, vector<32x32xf32> -> vector<32x32xf32>
    %c0_3 = arith.constant 0 : index
    %c0_4 = arith.constant 0 : index
    %3 = vector.load %arg3[%c0_3, %c0_4] : memref<1x32xf32, #tpu.memory_space<vmem>>, vector<1x32xf32>
    %4 = vector.broadcast %3 : vector<1x32xf32> to vector<32x32xf32>
    %5 = arith.addf %2, %4 : vector<32x32xf32>
    %c0_5 = arith.constant 0 : index
    %c0_6 = arith.constant 0 : index
    %6 = vector.load %arg4[%c0_5, %c0_6] : memref<32x32xf32, #tpu.memory_space<vmem>>, vector<32x32xf32>
    tpu.vector_store %arg4[%c0_5, %c0_6], %5 {strides = array<i32>} : memref<32x32xf32, #tpu.memory_space<vmem>>, vector<32x32xf32>,
    return
  }
  func.func @transform_0(%arg0: i32) -> (i32, i32) {
    %c0_i32 = arith.constant 0 : i32
    %c0_i32_0 = arith.constant 0 : i32
    return %arg0, %c0_i32 : i32, i32
  }
  func.func @transform_1(%arg0: i32) -> (i32, i32) {
    %c0_i32 = arith.constant 0 : i32
    %c0_i32_0 = arith.constant 0 : i32
    %c0_i32_1 = arith.constant 0 : i32
    return %c0_i32, %c0_i32_0 : i32, i32
  }
  func.func @transform_2(%arg0: i32) -> (i32, i32) {
    %c0_i32 = arith.constant 0 : i32
    %c0_i32_0 = arith.constant 0 : i32
    %c0_i32_1 = arith.constant 0 : i32
    return %c0_i32, %c0_i32_0 : i32, i32
  }
  func.func @transform_3(%arg0: i32) -> (i32, i32) {
    %c0_i32 = arith.constant 0 : i32
    %c0_i32_0 = arith.constant 0 : i32
    return %arg0, %c0_i32 : i32, i32
  }
}

</mosaic_0001>

<bundles_post_ra>
// kernel: tpu_custom_call.1
= control target key start
LH: loop header
LB: loop body
LE: loop exit
PB: predicated region body
PF: predicated region fallthrough
CT: control target
= control target key end

     0   :  { %vm69_vm0 = vcmask 523264   ;;  %s251_s0 = inlined_call_operand.vmem [shape: bf16[32,64], index: 0, kind: input, shape index: {}]   ;;  %s252_s1 = inlined_call_operand.vmem [shape: bf16[64,32], index: 1, kind: input, shape index: {}]   ;;  %s253_s2 = inlined_call_operand.vmem [shape: f32[1,32], index: 2, kind: input, shape index: {}]   ;;  %s254_s3 = inlined_call_operand.hbm [shape: f32[32,32], index: 3, kind: output, shape index: {}]  }
   0x1   :  { %v176_v0 = vld [vmem:[%s252_s1 + $0x18] sm:$0xff]   ;;  %v177_v1 = vld [vmem:[%s252_s1 + $0x10] sm:$0xff]   ;;  %v178_v2 = vld [vmem:[%s252_s1 + $0x8] sm:$0xff]  }
   0x2   :  { %161 = vmatprep.subr.bf16.mxu0 %v176_v0  ;;  %v180_v3 = vld [vmem:[%s251_s0] sm:$0xff]  }
   0x3   :  { %162 = vmatpush3.bf16.msra.mxu0 %v176_v0  ;;  %169 = vmatprep.mubr.msk.bf16.mxu0 %vm69_vm0, %v180_v3 }
   0x4   :  { %163 = vmatprep.subr.bf16.mxu0 %v177_v1 }
   0x5   :  { %8 = vsyncpa [#allocation3], 0  ;;  %v179_v4 = vld [vmem:[%s252_s1] sm:$0xff]   ;;  %v181_v5 = vld [vmem:[%s251_s0 + $0x8] sm:$0xff]   ;;  %vm125_vm1 = vcmask 261120   ;;  %s204_s26 = smov [#allocation2]  }
   0x6   :  { %v146_v6 = vld [vmem:[%s253_s2] ss:$0 sm:$0xff]  ;;  %s135_s1 = sshll.u32 %s204_s26, 4  ;;  %s136_s1 = int_to_ptr.vmem [resolvable:$true] %s135_s1 }
   0x7   :  { %164 = vmatpush3.bf16.msra.mxu0 %v177_v1  ;;  %s182_s0 = scalar_lea.vmem %s136_s1, 512  ;;  %p187_p1 = scmp.lt.s32.totalorder %s136_s1, %s136_s1 }
   0x8   :  { %165 = vmatprep.subr.bf16.mxu0 %v178_v2  ;;  %p183_p0 = scmp.ne.s32.totalorder %s136_s1, %s182_s0  ;;  %p188_p2 = scmp.lt.s32.totalorder %s182_s0, %s182_s0 }
   0xa   :  { %p189_p3 = por %p188_p2, %p187_p1 }
   0xb   :  { %166 = vmatpush3.bf16.msra.mxu0 %v178_v2 }
   0xc   :  { %167 = vmatprep.subr.bf16.mxu0 %v179_v4  ;;  %p190_p4 = pnand %p189_p3, %p183_p0 }
   0xf   :  { %168 = vmatpush3.bf16.msra.mxu0 %v179_v4 }
  0x12   :  { %170 = vmatmul.mubr.msk.bf16.vlgmr.msra.gmra.mxu0 %vm69_vm0, %v181_v5 }
  0xd2   :  { %v171_v7 = vpop.f32.mrf.mxu0 }
  0xd3   :  { %v119_v8 = vadd.f32 %v171_v7, %v146_v6 }
  0xd4   :  { %v110_v9 = vpop.f32.mrf.mxu0 }
  0xd5   :  { %128 = vst.msk [vmem:[#allocation2 + $0x10] sm:$0xff] %vm125_vm1, %v119_v8  ;;  %v111_v10 = vadd.f32 %v146_v6, %v110_v9 }
  0xd6   :  { %v172_v11 = vpop.f32.mrf.mxu0 }
  0xd7   :  { %126 = vst.msk [vmem:[#allocation2] sm:$0xff] %vm125_vm1, %v111_v10  ;;  %v122_v12 = vadd.f32 %v172_v11, %v146_v6 }
  0xd8   :  { %v113_v13 = vpop.f32.mrf.mxu0 }
  0xd9   :  { %129 = vst.msk [vmem:[#allocation2 + $0x18] sm:$0xff] %vm125_vm1, %v122_v12  ;;  %v114_v14 = vadd.f32 %v146_v6, %v113_v13 }
  0xdb   :  { %127 = vst.msk [vmem:[#allocation2 + $0x8] sm:$0xff] %vm125_vm1, %v114_v14 }
  0xdc   :  { %193 = shalt.err (!%p190_p4)
}
  0xdd   :  { %s205_s2 = smov 128   ;;  %s206_s27 = smov 8  }
  0xde   :  { %141 = dma.vmem_to_hbm [thread:$0]  %s136_s1, 512, %s254_s3, [#allocation3], %s205_s2, %s205_s2, %s206_s27  }
  0xdf   :  { %202 = dma.done.wait [#allocation3], 512  }
  0xe0   :  { %203 = vsyncadd [#allocation3], 4294966784 }
  0xe1   :  { %145 = vsyncpa [#allocation3], 1 }

</bundles_post_ra>
